<compile_context>
chip_gen: v5e
topology: v5e:2x2
jax: 0.10.0
libtpu: 0.0.40
codegen_flags: <defaults>
</compile_context>

<pallas_src>
import functools

import jax
import jax.numpy as jnp
from jax.experimental import pallas as pl
from jax.experimental.pallas import tpu as pltpu

KH, KW = 9, 2          # Conv2d kernel_size=(9, 2)
OUT_FEATURES = 30      # LazyLinear(30)
NB_MAX = 1024          # max images per grid step (per review: 1024-2048)


def _round_up(v, m):
    return ((v + m - 1) // m) * m


@functools.lru_cache(maxsize=1)
def _tensorcores_per_chip():
    """2 on v7x-class chips (megacore grid sharding), else 1."""
    try:
        kind = jax.devices()[0].device_kind.lower()
    except Exception:
        return 1
    return 2 if ("v7" in kind or "7x" in kind) else 1


def _choose_nb(N):
    """Batch-block size.

    Single-TC chips (v5e/v6e): one grid step whenever N <= NB_MAX (the grid is
    a serial loop there, splitting only adds per-step overhead).
    v7x (2 TCs): >= 2 and up to 8 evenly sized steps so both cores stay busy.
    """
    cores = _tensorcores_per_chip()
    if N <= 8 or cores <= 1:
        return max(1, min(N, NB_MAX))
    steps = max(2, min(8, pl.cdiv(N, 256)))
    return max(8, min(NB_MAX, _round_up(pl.cdiv(N, steps), 8)))


# --------------------------------------------------------------------------- #
# Weight fold (run ONCE per weight set; hoisted out of the per-call path).
# --------------------------------------------------------------------------- #
def fold_params(conv_w, conv_b, lin_w, lin_b, H, W, *, use_bf16=False):
    """Fold Conv2d(1,1,(9,2)) + Linear(w_out -> 30) into one dense operator.

    Returns:
      w_big    : (K_pad, out_cols_pad)  with K_pad = round_up(H*W, 128),
                 out_cols_pad = round_up((H-8)*30, 128); zero padded.
      bias_big : (1, out_cols_pad)
    """
    h_out = H - KH + 1
    w_out = W - KW + 1
    assert h_out >= 1 and w_out >= 1
    assert lin_w.shape == (OUT_FEATURES, w_out), "LazyLinear in_features == conv W_out"

    f32 = jnp.float32
    conv_w2 = conv_w.reshape(KH, KW).astype(f32)          # (9, 2)
    lin_w_t = lin_w.T.astype(f32)                         # (w_out, 30)

    # Fold conv taps along W into the linear weight:
    #   M[a, w', o] = sum_b conv_w[a, b] * lin_w[o, w'-b]   (valid shifts)
    M = jnp.zeros((KH, W, OUT_FEATURES), f32)
    for b in range(KW):
        M = M.at[:, b:b + w_out, :].add(conv_w2[:, b][:, None, None] * lin_w_t[None, :, :])

    # Fold conv along H into a dense (H*W, h_out*30) operator:
    #   W_big[h, w', i, o] = M[h - i, w', o]   for 0 <= h - i < KH
    w_big4 = jnp.zeros((H, W, h_out, OUT_FEATURES), f32)
    for i in range(h_out):
        w_big4 = w_big4.at[i:i + KH, :, i, :].add(M)

    K = H * W
    K_pad = _round_up(K, 128)                 # lane/tile-aligned contraction dim
    out_cols = h_out * OUT_FEATURES
    out_cols_pad = _round_up(out_cols, 128)   # lane-dense output width

    w_big = jnp.zeros((K_pad, out_cols_pad), f32)
    w_big = w_big.at[:K, :out_cols].set(w_big4.reshape(K, out_cols))

    bias_eff = conv_b.reshape(()).astype(f32) * lin_w_t.sum(axis=0) + lin_b.astype(f32)
    bias_big = jnp.zeros((1, out_cols_pad), f32)
    bias_big = bias_big.at[0, :out_cols].set(jnp.tile(bias_eff, h_out))

    if use_bf16:
        w_big = w_big.astype(jnp.bfloat16)    # accumulation stays f32 in the kernel
    return w_big, bias_big


# --------------------------------------------------------------------------- #
# Kernel: one batch block per grid step.
# --------------------------------------------------------------------------- #
def _fused_kernel(x_ref, w_ref, b_ref, o_ref):
    """
    x_ref : (NB, K_pad)              VMEM   flattened images (lane-dense rows)
    w_ref : (K_pad, OUT_PAD)         VMEM   folded conv+linear weight (resident)
    b_ref : (1, OUT_PAD)             VMEM   folded bias
    o_ref : (NB, OUT_PAD)            VMEM   sigmoid(x @ W + b), lane-dense store
    """
    z = jnp.dot(x_ref[...], w_ref[...], preferred_element_type=jnp.float32)
    o_ref[...] = jax.nn.sigmoid(z + b_ref[...])


# --------------------------------------------------------------------------- #
# Hot-path forward using the pre-folded weights.
# --------------------------------------------------------------------------- #
@functools.partial(jax.jit, static_argnames=("nb",))
def neural_network_forward_folded(x, w_big, bias_big, nb=None):
    """x: (N, 1, H, W) f32 -> (N, 1, H-8, 30) f32 (same as the PyTorch module)."""
    N, C, H, W = x.shape
    assert C == 1
    h_out = H - KH + 1
    K = H * W
    K_pad, out_cols_pad = w_big.shape
    out_cols = h_out * OUT_FEATURES
    assert K_pad == _round_up(K, 128) and out_cols_pad >= out_cols

    # Lane-dense rows (contiguous reshape -> no HBM copy); pad K only if needed.
    x2 = x.reshape(N, K).astype(w_big.dtype)
    if K_pad != K:
        x2 = jnp.pad(x2, ((0, 0), (0, K_pad - K)))

    if nb is None:
        nb = _choose_nb(N)
    assert nb >= 1 and (nb % 8 == 0 or nb == N)
    grid = (pl.cdiv(N, nb),)   # no row padding: boundary block handled by Pallas

    # Resident weight: single-buffer it when large (constant index map).
    weight_bytes = K_pad * out_cols_pad * jnp.dtype(w_big.dtype).itemsize
    big_weight = weight_bytes > (8 << 20)
    resident_kw = {"pipeline_mode": pl.Buffered(1)} if big_weight else {}

    # Raise the scoped VMEM limit only when the footprint actually needs it
    # (v6e: 128 MiB physical / 32 MiB scoped default; v7x: 64 MiB physical).
    in_bpe = jnp.dtype(w_big.dtype).itemsize
    vmem_need = ((1 if big_weight else 2) * weight_bytes
                 + 2 * out_cols_pad * 4
                 + 2 * nb * K_pad * in_bpe
                 + 2 * nb * out_cols_pad * 4)
    vmem_limit = None
    if vmem_need > (30 << 20):
        vmem_limit = min(int(vmem_need * 5 // 4), 64 << 20)

    out = pl.pallas_call(
        _fused_kernel,
        out_shape=jax.ShapeDtypeStruct((N, out_cols_pad), jnp.float32),
        grid=grid,
        in_specs=[
            pl.BlockSpec((nb, K_pad), lambda n: (n, 0)),                          # batch block
            pl.BlockSpec((K_pad, out_cols_pad), lambda n: (0, 0), **resident_kw),  # folded weight
            pl.BlockSpec((1, out_cols_pad), lambda n: (0, 0)),                    # folded bias
        ],
        out_specs=pl.BlockSpec((nb, out_cols_pad), lambda n: (n, 0)),
        compiler_params=pltpu.CompilerParams(
            dimension_semantics=("parallel",),
            vmem_limit_bytes=vmem_limit),
    )(x2, w_big, bias_big)

    out = out[:, :out_cols].reshape(N, h_out, OUT_FEATURES)
    return out[:, None, :, :]                            # (N, 1, h_out, 30)


def neural_network_forward(x, conv_w, conv_b, lin_w, lin_b):
    """Convenience one-shot interface (folds weights on every call)."""
    _, _, H, W = x.shape
    w_big, bias_big = fold_params(conv_w, conv_b, lin_w, lin_b, H, W)
    return neural_network_forward_folded(x, w_big, bias_big)


def _reference_forward(x, conv_w, conv_b, lin_w, lin_b):
    """Pure-JAX reference mirroring PyTorch semantics, for correctness checks."""
    N, _, H, W = x.shape
    h_out, w_out = H - KH + 1, W - KW + 1
    co = jnp.zeros((N, h_out, w_out), jnp.float32)
    for a in range(KH):
        for b in range(KW):
            co = co + conv_w[0, 0, a, b] * x[:, 0, a:a + h_out, b:b + w_out]
    co = co + conv_b[0]
    z = jnp.einsum('nhw,ow->nho', co, lin_w) + lin_b
    return jax.nn.sigmoid(z)[:, None, :, :]


if __name__ == "__main__":
    key = jax.random.PRNGKey(0)
    k1, k2, k3, k4, k5, k6 = jax.random.split(key, 6)

    # Small shapes consistent with the module: N=2, C=1, H=16 (>= 9), W=16 (>= 2).
    N, H, W = 2, 16, 16
    w_out = W - KW + 1  # LazyLinear in_features = 15

    x = jax.random.normal(k1, (N, 1, H, W), dtype=jnp.float32)
    conv_w = 0.1 * jax.random.normal(k2, (1, 1, KH, KW), dtype=jnp.float32)
    conv_b = 0.1 * jax.random.normal(k3, (1,), dtype=jnp.float32)
    lin_w = 0.1 * jax.random.normal(k4, (OUT_FEATURES, w_out), dtype=jnp.float32)
    lin_b = 0.1 * jax.random.normal(k5, (OUT_FEATURES,), dtype=jnp.float32)

    # Fold the weights ONCE (hoisted out of the per-call path).
    w_big, bias_big = fold_params(conv_w, conv_b, lin_w, lin_b, H, W)

    out = jax.block_until_ready(neural_network_forward_folded(x, w_big, bias_big))
    ref = _reference_forward(x, conv_w, conv_b, lin_w, lin_b)
    assert out.shape == (N, 1, H - KH + 1, OUT_FEATURES), out.shape
    assert jnp.allclose(out, ref, atol=2e-5, rtol=2e-5), "mismatch vs reference (N=2)"

    # Partial boundary-block path (no wrapper-side row padding): force nb=8 on
    # N=10 so the last block reads OOB rows and its OOB writes are dropped.
    N2 = 10
    xb = jax.random.normal(k6, (N2, 1, H, W), dtype=jnp.float32)
    out2 = jax.block_until_ready(neural_network_forward_folded(xb, w_big, bias_big, nb=8))
    ref2 = _reference_forward(xb, conv_w, conv_b, lin_w, lin_b)
    assert out2.shape == (N2, 1, H - KH + 1, OUT_FEATURES), out2.shape
    assert jnp.allclose(out2, ref2, atol=2e-5, rtol=2e-5), "mismatch vs reference (N=10, nb=8)"

    # Default block selection on the same batch (single step on v5e/v6e,
    # 2 balanced steps on v7x).
    out3 = jax.block_until_ready(neural_network_forward_folded(xb, w_big, bias_big))
    assert jnp.allclose(out3, ref2, atol=2e-5, rtol=2e-5), "mismatch vs reference (N=10, auto nb)"

    print("KERNEL_OK")
</pallas_src>

<mosaic_0001>
module attributes {stable_mosaic.version = 11 : i64} {
  func.func @_fused_kernel(%arg0: i32, %arg1: memref<2x256xf32, #tpu.memory_space<vmem>>, %arg2: memref<256x256xf32, #tpu.memory_space<vmem>>, %arg3: memref<1x256xf32, #tpu.memory_space<vmem>>, %arg4: memref<2x256xf32, #tpu.memory_space<vmem>>) attributes {dimension_semantics = [#tpu.dimension_semantics<parallel>], iteration_bounds = array<i64: 1>, scalar_prefetch = 0 : i64, scratch_operands = 0 : i64, tpu.core_type = #tpu.core_type<tc>, window_params = [{transform_indices = @transform_0, window_bounds = array<i64: 2, 256>}, {pipeline_mode = #tpu.pipeline_mode<synchronous>, transform_indices = @transform_1, window_bounds = array<i64: 256, 256>}, {pipeline_mode = #tpu.pipeline_mode<synchronous>, transform_indices = @transform_2, window_bounds = array<i64: 1, 256>}, {transform_indices = @transform_3, window_bounds = array<i64: 2, 256>}]} {
    %c0 = arith.constant 0 : index
    %c0_0 = arith.constant 0 : index
    %0 = vector.load %arg1[%c0, %c0_0] : memref<2x256xf32, #tpu.memory_space<vmem>>, vector<2x256xf32>
    %c0_1 = arith.constant 0 : index
    %c0_2 = arith.constant 0 : index
    %1 = vector.load %arg2[%c0_1, %c0_2] : memref<256x256xf32, #tpu.memory_space<vmem>>, vector<256x256xf32>
    %cst = arith.constant dense<0.000000e+00> : vector<2x256xf32>
    %2 = tpu.matmul %0, %1, %cst {dimension_numbers = #tpu.dot_dimension_numbers<[1], [0], [0], [1], [0, 0, 1, 1], [], []>} : vector<2x256xf32>, vector<256x256xf32>, vector<2x256xf32> -> vector<2x256xf32>
    %c0_3 = arith.constant 0 : index
    %c0_4 = arith.constant 0 : index
    %3 = vector.load %arg3[%c0_3, %c0_4] : memref<1x256xf32, #tpu.memory_space<vmem>>, vector<1x256xf32>
    %4 = vector.broadcast %3 : vector<1x256xf32> to vector<2x256xf32>
    %5 = arith.addf %2, %4 : vector<2x256xf32>
    %6 = arith.negf %5 : vector<2x256xf32>
    %7 = math.exp %6 : vector<2x256xf32>
    %cst_5 = arith.constant 1.000000e+00 : f32
    %8 = vector.broadcast %cst_5 : f32 to vector<2x256xf32>
    %9 = arith.addf %8, %7 : vector<2x256xf32>
    %10 = arith.divf %8, %9 : vector<2x256xf32>
    %c0_6 = arith.constant 0 : index
    %c0_7 = arith.constant 0 : index
    %11 = vector.load %arg4[%c0_6, %c0_7] : memref<2x256xf32, #tpu.memory_space<vmem>>, vector<2x256xf32>
    tpu.vector_store %arg4[%c0_6, %c0_7], %10 {strides = array<i32>} : memref<2x256xf32, #tpu.memory_space<vmem>>, vector<2x256xf32>,
    return
  }
  func.func @transform_0(%arg0: i32) -> (i32, i32) {
    %c0_i32 = arith.constant 0 : i32
    %c0_i32_0 = arith.constant 0 : i32
    return %arg0, %c0_i32 : i32, i32
  }
  func.func @transform_1(%arg0: i32) -> (i32, i32) {
    %c0_i32 = arith.constant 0 : i32
    %c0_i32_0 = arith.constant 0 : i32
    %c0_i32_1 = arith.constant 0 : i32
    return %c0_i32, %c0_i32_0 : i32, i32
  }
  func.func @transform_2(%arg0: i32) -> (i32, i32) {
    %c0_i32 = arith.constant 0 : i32
    %c0_i32_0 = arith.constant 0 : i32
    %c0_i32_1 = arith.constant 0 : i32
    return %c0_i32, %c0_i32_0 : i32, i32
  }
  func.func @transform_3(%arg0: i32) -> (i32, i32) {
    %c0_i32 = arith.constant 0 : i32
    %c0_i32_0 = arith.constant 0 : i32
    return %arg0, %c0_i32 : i32, i32
  }
}

</mosaic_0001>

<bundles_post_ra>
// kernel: neural_network_forward_folded.1
= control target key start
LH: loop header
LB: loop body
LE: loop exit
PB: predicated region body
PF: predicated region fallthrough
CT: control target
= control target key end

     0   :  { %8 = vsyncpa [#allocation3], 0  ;;  %s276_s15 = smov [#allocation2]   ;;  %s277_s17 = smov 256   ;;  %s311_s0 = inlined_call_operand.vmem [shape: f32[2,256], index: 0, kind: input, shape index: {}]   ;;  %s312_s1 = inlined_call_operand.hbm [shape: f32[256,256], index: 1, kind: input, shape index: {}]   ;;  %s313_s2 = inlined_call_operand.vmem [shape: f32[1,256], index: 2, kind: input, shape index: {}]   ;;  %s314_s3 = inlined_call_operand.vmem [shape: f32[2,256], index: 3, kind: output, shape index: {}]  }
   0x1   :  { %s15_s14 = sshll.u32 %s312_s1, 4  ;;  %s17_s16 = sshll.u32 %s276_s15, 4  ;;  %s16_s14 = int_to_ptr.hbm [resolvable:$true] %s15_s14  ;;  %s18_s16 = int_to_ptr.vmem [resolvable:$true] %s17_s16 }
   0x2   :  { %s278_s18 = smov 16  }
   0x3   :  { %23 = dma.hbm_to_vmem [thread:$0]  %s16_s14, 8192, %s18_s16, [#allocation3], %s277_s17, %s277_s17, %s278_s18  }
   0x4   :  { %274 = dma.done.wait [#allocation3], 8192  }
   0x5   :  { %275 = vsyncadd [#allocation3], 4294959104  ;;  %v61_v0 = vld [vmem:[#allocation2 + $0xf0] sm:$0xff]  ;;  %v62_v1 = vld [vmem:[#allocation2 + $0xf8] sm:$0xff]  ;;  %vm228_vm7 = vcmask 1041408  }
   0x6   :  { %v59_v2 = vld [vmem:[#allocation2 + $0xe0] sm:$0xff]  ;;  %107 = vmatpush.msra.mxu0 %v61_v0  ;;  %147 = vmatpush.msra.mxu2 %v62_v1  ;;  %v93_v3 = vld [vmem:[#allocation2 + $0x1f0] sm:$0xff]  ;;  %v60_v4 = vld [vmem:[#allocation2 + $0xe8] sm:$0xff] }
   0x7   :  { %v94_v5 = vld [vmem:[#allocation2 + $0x1f8] sm:$0xff]  ;;  %127 = vmatpush.msra.mxu1 %v93_v3  ;;  %v57_v6 = vld [vmem:[#allocation2 + $0xd0] sm:$0xff]  ;;  %v91_v7 = vld [vmem:[#allocation2 + $0x1e0] sm:$0xff] }
   0x8   :  { %167 = vmatpush.msra.mxu3 %v94_v5  ;;  %v58_v8 = vld [vmem:[#allocation2 + $0xd8] sm:$0xff]  ;;  %108 = vmatpush.msra.mxu0 %v59_v2  ;;  %v92_v9 = vld [vmem:[#allocation2 + $0x1e8] sm:$0xff]  ;;  %v89_v10 = vld [vmem:[#allocation2 + $0x1d0] sm:$0xff] }
   0x9   :  { %148 = vmatpush.msra.mxu2 %v60_v4  ;;  %128 = vmatpush.msra.mxu1 %v91_v7  ;;  %v55_v11 = vld [vmem:[#allocation2 + $0xc0] sm:$0xff]  ;;  %v56_v12 = vld [vmem:[#allocation2 + $0xc8] sm:$0xff]  ;;  %v90_v13 = vld [vmem:[#allocation2 + $0x1d8] sm:$0xff] }
   0xa   :  { %168 = vmatpush.msra.mxu3 %v92_v9  ;;  %109 = vmatpush.msra.mxu0 %v57_v6  ;;  %v87_v14 = vld [vmem:[#allocation2 + $0x1c0] sm:$0xff]  ;;  %v88_v15 = vld [vmem:[#allocation2 + $0x1c8] sm:$0xff]  ;;  %v53_v16 = vld [vmem:[#allocation2 + $0xb0] sm:$0xff] }
   0xb   :  { %149 = vmatpush.msra.mxu2 %v58_v8  ;;  %129 = vmatpush.msra.mxu1 %v89_v10  ;;  %v54_v17 = vld [vmem:[#allocation2 + $0xb8] sm:$0xff]  ;;  %v85_v18 = vld [vmem:[#allocation2 + $0x1b0] sm:$0xff]  ;;  %v51_v20 = vld [vmem:[#allocation2 + $0xa0] sm:$0xff] }
   0xc   :  { %169 = vmatpush.msra.mxu3 %v90_v13  ;;  %110 = vmatpush.msra.mxu0 %v55_v11  ;;  %v86_v19 = vld [vmem:[#allocation2 + $0x1b8] sm:$0xff]  ;;  %v52_v21 = vld [vmem:[#allocation2 + $0xa8] sm:$0xff]  ;;  %v83_v22 = vld [vmem:[#allocation2 + $0x1a0] sm:$0xff] }
   0xd   :  { %150 = vmatpush.msra.mxu2 %v56_v12  ;;  %130 = vmatpush.msra.mxu1 %v87_v14  ;;  %v84_v23 = vld [vmem:[#allocation2 + $0x1a8] sm:$0xff]  ;;  %v49_v24 = vld [vmem:[#allocation2 + $0x90] sm:$0xff]  ;;  %v50_v25 = vld [vmem:[#allocation2 + $0x98] sm:$0xff] }
   0xe   :  { %170 = vmatpush.msra.mxu3 %v88_v15  ;;  %111 = vmatpush.msra.mxu0 %v53_v16  ;;  %v81_v26 = vld [vmem:[#allocation2 + $0x190] sm:$0xff]  ;;  %v82_v27 = vld [vmem:[#allocation2 + $0x198] sm:$0xff]  ;;  %v47_v28 = vld [vmem:[#allocation2 + $0x80] sm:$0xff] }
   0xf   :  { %151 = vmatpush.msra.mxu2 %v54_v17  ;;  %131 = vmatpush.msra.mxu1 %v85_v18  ;;  %v48_v29 = vld [vmem:[#allocation2 + $0x88] sm:$0xff]  ;;  %v79_v30 = vld [vmem:[#allocation2 + $0x180] sm:$0xff]  ;;  %v45_v32 = vld [vmem:[#allocation2 + $0x70] sm:$0xff] }
  0x10   :  { %171 = vmatpush.msra.mxu3 %v86_v19  ;;  %112 = vmatpush.msra.mxu0 %v51_v20  ;;  %v80_v31 = vld [vmem:[#allocation2 + $0x188] sm:$0xff]  ;;  %v46_v33 = vld [vmem:[#allocation2 + $0x78] sm:$0xff]  ;;  %v77_v34 = vld [vmem:[#allocation2 + $0x170] sm:$0xff] }
  0x11   :  { %152 = vmatpush.msra.mxu2 %v52_v21  ;;  %132 = vmatpush.msra.mxu1 %v83_v22  ;;  %v78_v35 = vld [vmem:[#allocation2 + $0x178] sm:$0xff]  ;;  %v43_v36 = vld [vmem:[#allocation2 + $0x60] sm:$0xff]  ;;  %v44_v37 = vld [vmem:[#allocation2 + $0x68] sm:$0xff] }
  0x12   :  { %172 = vmatpush.msra.mxu3 %v84_v23  ;;  %113 = vmatpush.msra.mxu0 %v49_v24  ;;  %v75_v38 = vld [vmem:[#allocation2 + $0x160] sm:$0xff]  ;;  %v76_v39 = vld [vmem:[#allocation2 + $0x168] sm:$0xff]  ;;  %v41_v40 = vld [vmem:[#allocation2 + $0x50] sm:$0xff] }
  0x13   :  { %153 = vmatpush.msra.mxu2 %v50_v25  ;;  %133 = vmatpush.msra.mxu1 %v81_v26  ;;  %v42_v41 = vld [vmem:[#allocation2 + $0x58] sm:$0xff]  ;;  %v73_v42 = vld [vmem:[#allocation2 + $0x150] sm:$0xff]  ;;  %v39_v44 = vld [vmem:[#allocation2 + $0x40] sm:$0xff] }
  0x14   :  { %173 = vmatpush.msra.mxu3 %v82_v27  ;;  %114 = vmatpush.msra.mxu0 %v47_v28  ;;  %v74_v43 = vld [vmem:[#allocation2 + $0x158] sm:$0xff]  ;;  %v40_v45 = vld [vmem:[#allocation2 + $0x48] sm:$0xff]  ;;  %v71_v47 = vld [vmem:[#allocation2 + $0x140] sm:$0xff] }
  0x15   :  { %154 = vmatpush.msra.mxu2 %v48_v29  ;;  %134 = vmatpush.msra.mxu1 %v79_v30  ;;  %v30_v46 = vld [vmem:[%s311_s0] sm:$0xf]  ;;  %v72_v48 = vld [vmem:[#allocation2 + $0x148] sm:$0xff]  ;;  %v37_v49 = vld [vmem:[#allocation2 + $0x30] sm:$0xff] }
  0x16   :  { %174 = vmatpush.msra.mxu3 %v80_v31  ;;  %115 = vmatpush.msra.mxu0 %v45_v32  ;;  %102 = vst [vmem:[#allocation1] ss:$4 sm:$0xff] %v30_v46  ;;  %v38_v50 = vld [vmem:[#allocation2 + $0x38] sm:$0xff]  ;;  %v69_v51 = vld [vmem:[#allocation2 + $0x130] sm:$0xff]  ;;  %v35_v53 = vld [vmem:[#allocation2 + $0x20] sm:$0xff] }
  0x17   :  { %155 = vmatpush.msra.mxu2 %v46_v33  ;;  %135 = vmatpush.msra.mxu1 %v77_v34  ;;  %v70_v52 = vld [vmem:[#allocation2 + $0x138] sm:$0xff]  ;;  %v36_v54 = vld [vmem:[#allocation2 + $0x28] sm:$0xff]  ;;  %v67_v55 = vld [vmem:[#allocation2 + $0x120] sm:$0xff] }
  0x18   :  { %175 = vmatpush.msra.mxu3 %v78_v35  ;;  %116 = vmatpush.msra.mxu0 %v43_v36  ;;  %v68_v56 = vld [vmem:[#allocation2 + $0x128] sm:$0xff]  ;;  %v33_v57 = vld [vmem:[#allocation2 + $0x10] sm:$0xff]  ;;  %v34_v58 = vld [vmem:[#allocation2 + $0x18] sm:$0xff] }
  0x19   :  { %156 = vmatpush.msra.mxu2 %v44_v37  ;;  %136 = vmatpush.msra.mxu1 %v75_v38  ;;  %v65_v59 = vld [vmem:[#allocation2 + $0x110] sm:$0xff]  ;;  %v66_v60 = vld [vmem:[#allocation2 + $0x118] sm:$0xff]  ;;  %v31_v61 = vld [vmem:[#allocation2] sm:$0xff] }
  0x1a   :  { %176 = vmatpush.msra.mxu3 %v76_v39  ;;  %117 = vmatpush.msra.mxu0 %v41_v40  ;;  %v32_v62 = vld [vmem:[#allocation2 + $0x8] sm:$0xff]  ;;  %v63_v0 = vld [vmem:[#allocation2 + $0x100] sm:$0xff]  ;;  %v95_v3 = vld [vmem:[%s313_s2] sm:$0x3] }
  0x1b   :  { %157 = vmatpush.msra.mxu2 %v42_v41  ;;  %137 = vmatpush.msra.mxu1 %v73_v42  ;;  %v64_v1 = vld [vmem:[#allocation2 + $0x108] sm:$0xff]  ;;  %v97_v4 = vperm.slane %v95_v3, 0  ;;  %v98_v9 = vperm.slane %v95_v3, 1 }
  0x1c   :  { %177 = vmatpush.msra.mxu3 %v74_v43  ;;  %118 = vmatpush.msra.mxu0 %v39_v44 }
  0x1d   :  { %158 = vmatpush.msra.mxu2 %v40_v45  ;;  %138 = vmatpush.msra.mxu1 %v71_v47  ;;  %v103_v63 = vld.sshfl [vmem:[#allocation1] sm:$0xff pattern:$0x73625140]  ;;  %v104_v2 = vld.sshfl [vmem:[#allocation1 + $0x8] sm:$0xff pattern:$0x73625140] }
  0x1e   :  { %178 = vmatpush.msra.mxu3 %v72_v48  ;;  %119 = vmatpush.msra.mxu0 %v37_v49 }
  0x1f   :  { %159 = vmatpush.msra.mxu2 %v38_v50  ;;  %139 = vmatpush.msra.mxu1 %v69_v51 }
  0x20   :  { %179 = vmatpush.msra.mxu3 %v70_v52  ;;  %120 = vmatpush.msra.mxu0 %v35_v53 }
  0x21   :  { %160 = vmatpush.msra.mxu2 %v36_v54  ;;  %140 = vmatpush.msra.mxu1 %v67_v55 }
  0x22   :  { %180 = vmatpush.msra.mxu3 %v68_v56  ;;  %121 = vmatpush.msra.mxu0 %v33_v57 }
  0x23   :  { %161 = vmatpush.msra.mxu2 %v34_v58  ;;  %141 = vmatpush.msra.mxu1 %v65_v59 }
  0x24   :  { %181 = vmatpush.msra.mxu3 %v66_v60  ;;  %122 = vmatpush.msra.mxu0 %v31_v61 }
  0x25   :  { %162 = vmatpush.msra.mxu2 %v32_v62  ;;  %123 = vmatmul.f32.vlgmr.msra.gmra.mxu0 %v103_v63 }
  0x26   :  { %163 = vmatmul.f32.vlgmr.msra.gmra.mxu2 %v103_v63  ;;  %142 = vmatpush.msra.mxu1 %v63_v0 }
  0x27   :  { %182 = vmatpush.msra.mxu3 %v64_v1  ;;  %143 = vmatmul.f32.vlgmr.msra.gmra.mxu1 %v104_v2 }
  0x28   :  { %183 = vmatmul.f32.vlgmr.msra.gmra.mxu3 %v104_v2 }
  0xa2   :  { %v124_v5 = vpop.f32.mrf.mxu0 }
  0xa3   :  { %v125_v6 = vadd.f32 %v124_v5, %v97_v4 }
  0xa4   :  { %v144_v7 = vpop.f32.mrf.mxu1 }
  0xa5   :  { %v145_v8 = vadd.f32 %v144_v7, %v125_v6 }
  0xa7   :  { %v237_v10 = vmul.f32 -1.442695, %v145_v8 }
  0xa9   :  { %v164_v11 = vpop.f32.mrf.mxu2  ;;  %242 = vpow2.f32 %v237_v10 }
  0xaa   :  { %v165_v12 = vadd.f32 %v164_v11, %v98_v9 }
  0xab   :  { %v184_v13 = vpop.f32.mrf.mxu3 }
  0xac   :  { %v185_v14 = vadd.f32 %v184_v13, %v165_v12 }
  0xae   :  { %v238_v15 = vmul.f32 -1.442695, %v185_v14 }
  0xaf   :  { %v243_v16 = vpop.eup %242 }
  0xb0   :  { %244 = vpow2.f32 %v238_v15  ;;  %v193_v17 = vadd.f32 1.0, %v243_v16 }
  0xb2   :  { %246 = vrcp.f32 %v193_v17  ;;  %vm200_vm0 = vweird.f32 %v193_v17  ;;  %v206_v31 = vand.u32 2147483648, %v193_v17  ;;  %v204_v32 = vand.u32 2147483647, %v193_v17 }
  0xb4   :  { %v207_v37 = vor.u32 1.1754944e-38, %v206_v31  ;;  %vm205_vm8 = vcmp.eq.f32.partialorder %v204_v32, 8.507059e+37 }
  0xb6   :  { %v245_v18 = vpop.eup %244 }
  0xb7   :  { %v194_v19 = vadd.f32 1.0, %v245_v18 }
  0xb8   :  { %v247_v20 = vpop.eup %246 }
  0xb9   :  { %248 = vrcp.f32 %v194_v19  ;;  %v196_v21 = vmul.f32 %v247_v20, %v193_v17  ;;  %vm201_vm1 = vweird.f32 %v247_v20  ;;  %v221_v27 = vand.u32 2147483648, %v194_v19 }
  0xba   :  { %v219_v30 = vand.u32 2147483647, %v194_v19  ;;  %vm202_vm3 = vmor %vm200_vm0, %vm201_vm1  ;;  %vm215_vm4 = vweird.f32 %v194_v19 }
  0xbb   :  { %v197_v22 = vsub.f32 1.0, %v196_v21  ;;  %v222_v34 = vor.u32 1.1754944e-38, %v221_v27 }
  0xbc   :  { %vm220_vm6 = vcmp.eq.f32.partialorder %v219_v30, 8.507059e+37 }
  0xbd   :  { %v198_v24 = vmul.f32 %v247_v20, %v197_v22 }
  0xbf   :  { %v249_v23 = vpop.eup %248  ;;  %v199_v28 = vadd.f32 %v247_v20, %v198_v24 }
  0xc0   :  { %v211_v25 = vmul.f32 %v249_v23, %v194_v19  ;;  %vm216_vm2 = vweird.f32 %v249_v23 }
  0xc1   :  { %vm217_vm5 = vmor %vm215_vm4, %vm216_vm2  ;;  %v203_v35 = vsel %vm202_vm3, %v247_v20, %v199_v28 }
  0xc2   :  { %v212_v26 = vsub.f32 1.0, %v211_v25  ;;  %v208_v40 = vsel %vm205_vm8, %v207_v37, %v203_v35 }
  0xc4   :  { %v213_v29 = vmul.f32 %v249_v23, %v212_v26 }
  0xc6   :  { %v214_v33 = vadd.f32 %v249_v23, %v213_v29 }
  0xc8   :  { %v218_v36 = vsel %vm217_vm5, %v249_v23, %v214_v33 }
  0xc9   :  { %v223_v38 = vsel %vm220_vm6, %v222_v34, %v218_v36 }
  0xca   :  { %v227_v39 = vrot.slane %v223_v38, 6 }
  0xcc   :  { %v229_v41 = vsel %vm228_vm7, %v208_v40, %v227_v39 }
  0xcd   :  { %231 = vst [vmem:[%s314_s3] sm:$0xf] %v229_v41 }
  0xce   :  { %236 = vsyncpa [#allocation3], 1 }

</bundles_post_ra>
